<compile_context>
chip_gen: v6e
topology: v6e:2x2x1
jax: 0.10.0
libtpu: 0.0.40
codegen_flags: <defaults>
</compile_context>

<pallas_src>
import functools

import jax
import jax.numpy as jnp
from jax.experimental import pallas as pl
from jax.experimental.pallas import tpu as pltpu


def _round_up(x: int, m: int) -> int:
    return (x + m - 1) // m * m


def weights_mlp_kernel(x_ref, w1_ref, b1_ref, w2_ref, b2_ref, w3_ref, b3_ref,
                       w4_ref, b4_ref, o_ref, *, softmax: bool, use_relu: bool,
                       matmul_dtype):
    """Fused forward pass for one batch tile."""

    def dense(h, w_ref, b_ref):
        # MXU matmul (optionally bf16 operands) with f32 accumulation;
        # bias add stays f32 on the VPU.
        lhs = h.astype(matmul_dtype)
        return jnp.dot(lhs, w_ref[...], preferred_element_type=jnp.float32) + b_ref[...]

    h = x_ref[...]                                   # (TB, in) f32
    h = jnp.maximum(dense(h, w1_ref, b1_ref), 0.0)
    h = jnp.maximum(dense(h, w2_ref, b2_ref), 0.0)
    h = jnp.maximum(dense(h, w3_ref, b3_ref), 0.0)
    out = dense(h, w4_ref, b4_ref)                   # (TB, out) f32

    if softmax:
        # torch.nn.Softmax(-1): numerically stable softmax over the last axis.
        m = jnp.max(out, axis=-1, keepdims=True)
        e = jnp.exp(out - m)
        out = e * pl.reciprocal(jnp.sum(e, axis=-1, keepdims=True), approx=True)
    elif use_relu:
        out = jnp.maximum(out, 0.0)

    o_ref[...] = out.astype(o_ref.dtype)


def weights_mlp_forward(x_norm, params, *, softmax: bool, use_relu: bool,
                        matmul_dtype=jnp.bfloat16, batch_tile: int = 1024):
    """Run the fused MLP kernel over a (B, input_size) batch.

    x_norm: (B, input_size) float32
    params: dict with w1..w4 as (in, out) and b1..b4 as (1, out), float32
    matmul_dtype: dtype fed to the MXU (bf16 recommended on v6e/v7x; f32 exact)
    """
    B, input_size = x_norm.shape
    hidden_size = params["w1"].shape[1]
    hidden1_size = params["w2"].shape[1]
    hidden2_size = params["w3"].shape[1]
    output_size = params["w4"].shape[1]

    # Batch tile: at least one f32 sublane tile (8 rows), at most `batch_tile`.
    # Small batches collapse to a single grid step with minimal padding.
    tb = min(batch_tile, _round_up(max(B, 1), 8))
    b_pad = _round_up(B, tb)

    x = x_norm.astype(jnp.float32)
    if b_pad != B:
        x = jnp.pad(x, ((0, b_pad - B), (0, 0)))     # rows independent -> safe

    grid = (b_pad // tb,)

    weights = [params[f"w{i}"].astype(matmul_dtype) for i in (1, 2, 3, 4)]
    biases = [params[f"b{i}"].astype(jnp.float32) for i in (1, 2, 3, 4)]

    def resident_spec(arr):
        # Same block every grid step -> stays VMEM-resident, no re-DMA.
        return pl.BlockSpec(arr.shape, lambda i: (0, 0))

    in_specs = [pl.BlockSpec((tb, input_size), lambda i: (i, 0))]
    operands = [x]
    for w, b in zip(weights, biases):
        in_specs += [resident_spec(w), resident_spec(b)]
        operands += [w, b]

    flops = 2 * b_pad * (input_size * hidden_size + hidden_size * hidden1_size
                         + hidden1_size * hidden2_size + hidden2_size * output_size)
    transcendentals = b_pad * output_size if softmax else 0
    bytes_accessed = int(
        x.size * x.dtype.itemsize
        + sum(w.size * w.dtype.itemsize for w in weights)
        + sum(b.size * b.dtype.itemsize for b in biases)
        + b_pad * output_size * 4)

    kernel = functools.partial(weights_mlp_kernel, softmax=softmax,
                               use_relu=use_relu, matmul_dtype=matmul_dtype)

    out = pl.pallas_call(
        kernel,
        out_shape=jax.ShapeDtypeStruct((b_pad, output_size), jnp.float32),
        grid=grid,
        in_specs=in_specs,
        out_specs=pl.BlockSpec((tb, output_size), lambda i: (i, 0)),
        compiler_params=pltpu.CompilerParams(
            dimension_semantics=("parallel",)),           # megacore on v7x
        cost_estimate=pl.CostEstimate(flops=flops,
                                      transcendentals=transcendentals,
                                      bytes_accessed=bytes_accessed),
    )(*operands)

    return out[:B]


def init_params(key, input_size, hidden_size, hidden1_size, hidden2_size, output_size):
    """Deterministic init mimicking nn.Linear's U(-1/sqrt(fan_in), 1/sqrt(fan_in))."""
    dims = [(input_size, hidden_size),
            (hidden_size, hidden1_size),
            (hidden1_size, hidden2_size),
            (hidden2_size, output_size)]
    params = {}
    for i, (fan_in, fan_out) in enumerate(dims, start=1):
        key, kw, kb = jax.random.split(key, 3)
        bound = 1.0 / (fan_in ** 0.5)
        params[f"w{i}"] = jax.random.uniform(
            kw, (fan_in, fan_out), jnp.float32, minval=-bound, maxval=bound)
        params[f"b{i}"] = jax.random.uniform(
            kb, (1, fan_out), jnp.float32, minval=-bound, maxval=bound)
    return params


if __name__ == "__main__":
    # Shapes consistent with the module's forward.
    input_size, hidden_size, hidden1_size, hidden2_size, output_size = 16, 32, 32, 32, 8
    softmax = True       # matches WeightsMLP(softmax=True, ...)
    use_relu = False

    key = jax.random.PRNGKey(0)
    key, kparams = jax.random.split(key)
    params = init_params(kparams, input_size, hidden_size, hidden1_size,
                         hidden2_size, output_size)

    def ref_forward(x):
        h = jnp.maximum(x @ params["w1"] + params["b1"], 0.0)
        h = jnp.maximum(h @ params["w2"] + params["b2"], 0.0)
        h = jnp.maximum(h @ params["w3"] + params["b3"], 0.0)
        o = h @ params["w4"] + params["b4"]
        if softmax:
            o = jax.nn.softmax(o, axis=-1)
        elif use_relu:
            o = jnp.maximum(o, 0.0)
        return o

    # 1) Tiny batch, exact f32 MXU operands (matches the PyTorch module closely;
    #    only the approx EUP reciprocal in the softmax loosens the tolerance).
    #    Single grid step, tile = 8 rows.
    key, kx = jax.random.split(key)
    x_small = jax.random.normal(kx, (4, input_size), jnp.float32)
    out_small = jax.block_until_ready(
        weights_mlp_forward(x_small, params, softmax=softmax, use_relu=use_relu,
                            matmul_dtype=jnp.float32))
    ref_small = ref_forward(x_small)
    assert out_small.shape == (4, output_size)
    assert jnp.allclose(out_small, ref_small, atol=5e-3, rtol=5e-3)

    # 2) Batched path: B=2500 -> padded to 3072, grid of three 1024-row tiles,
    #    bf16 MXU operands with f32 accumulation; exercises the streaming
    #    pipeline with VMEM-resident weights.
    key, kx2 = jax.random.split(key)
    x_big = jax.random.normal(kx2, (2500, input_size), jnp.float32)
    out_big = jax.block_until_ready(
        weights_mlp_forward(x_big, params, softmax=softmax, use_relu=use_relu,
                            matmul_dtype=jnp.bfloat16))
    ref_big = ref_forward(x_big)
    assert out_big.shape == (2500, output_size)
    assert jnp.max(jnp.abs(out_big - ref_big)) < 3e-2

    # TODO(synk): get_weights()'s x/y normalization, concat, and un-scaling by
    # pol_ratios mean/std is trivial elementwise glue and is left in plain JAX.
    print("KERNEL_OK")
</pallas_src>

<mosaic_0001>
module attributes {stable_mosaic.version = 11 : i64} {
  func.func @weights_mlp_kernel(%arg0: i32, %arg1: memref<8x16xf32, #tpu.memory_space<vmem>>, %arg2: memref<16x32xf32, #tpu.memory_space<vmem>>, %arg3: memref<1x32xf32, #tpu.memory_space<vmem>>, %arg4: memref<32x32xf32, #tpu.memory_space<vmem>>, %arg5: memref<1x32xf32, #tpu.memory_space<vmem>>, %arg6: memref<32x32xf32, #tpu.memory_space<vmem>>, %arg7: memref<1x32xf32, #tpu.memory_space<vmem>>, %arg8: memref<32x8xf32, #tpu.memory_space<vmem>>, %arg9: memref<1x8xf32, #tpu.memory_space<vmem>>, %arg10: memref<8x8xf32, #tpu.memory_space<vmem>>) attributes {dimension_semantics = [#tpu.dimension_semantics<parallel>], iteration_bounds = array<i64: 1>, scalar_prefetch = 0 : i64, scratch_operands = 0 : i64, tpu.core_type = #tpu.core_type<tc>, window_params = [{transform_indices = @transform_0, window_bounds = array<i64: 8, 16>}, {pipeline_mode = #tpu.pipeline_mode<synchronous>, transform_indices = @transform_1, window_bounds = array<i64: 16, 32>}, {pipeline_mode = #tpu.pipeline_mode<synchronous>, transform_indices = @transform_2, window_bounds = array<i64: 1, 32>}, {pipeline_mode = #tpu.pipeline_mode<synchronous>, transform_indices = @transform_3, window_bounds = array<i64: 32, 32>}, {pipeline_mode = #tpu.pipeline_mode<synchronous>, transform_indices = @transform_4, window_bounds = array<i64: 1, 32>}, {pipeline_mode = #tpu.pipeline_mode<synchronous>, transform_indices = @transform_5, window_bounds = array<i64: 32, 32>}, {pipeline_mode = #tpu.pipeline_mode<synchronous>, transform_indices = @transform_6, window_bounds = array<i64: 1, 32>}, {pipeline_mode = #tpu.pipeline_mode<synchronous>, transform_indices = @transform_7, window_bounds = array<i64: 32, 8>}, {pipeline_mode = #tpu.pipeline_mode<synchronous>, transform_indices = @transform_8, window_bounds = array<i64: 1, 8>}, {transform_indices = @transform_9, window_bounds = array<i64: 8, 8>}]} {
    %c0 = arith.constant 0 : index
    %c0_0 = arith.constant 0 : index
    %0 = vector.load %arg1[%c0, %c0_0] : memref<8x16xf32, #tpu.memory_space<vmem>>, vector<8x16xf32>
    %c0_1 = arith.constant 0 : index
    %c0_2 = arith.constant 0 : index
    %1 = vector.load %arg2[%c0_1, %c0_2] : memref<16x32xf32, #tpu.memory_space<vmem>>, vector<16x32xf32>
    %cst = arith.constant dense<0.000000e+00> : vector<8x32xf32>
    %2 = tpu.matmul %0, %1, %cst {dimension_numbers = #tpu.dot_dimension_numbers<[1], [0], [0], [1], [0, 0, 1, 1], [], []>} : vector<8x16xf32>, vector<16x32xf32>, vector<8x32xf32> -> vector<8x32xf32>
    %c0_3 = arith.constant 0 : index
    %c0_4 = arith.constant 0 : index
    %3 = vector.load %arg3[%c0_3, %c0_4] : memref<1x32xf32, #tpu.memory_space<vmem>>, vector<1x32xf32>
    %4 = vector.broadcast %3 : vector<1x32xf32> to vector<8x32xf32>
    %5 = arith.addf %2, %4 : vector<8x32xf32>
    %cst_5 = arith.constant 0.000000e+00 : f32
    %6 = vector.broadcast %cst_5 : f32 to vector<8x32xf32>
    %7 = arith.maximumf %5, %6 : vector<8x32xf32>
    %c0_6 = arith.constant 0 : index
    %c0_7 = arith.constant 0 : index
    %8 = vector.load %arg4[%c0_6, %c0_7] : memref<32x32xf32, #tpu.memory_space<vmem>>, vector<32x32xf32>
    %cst_8 = arith.constant dense<0.000000e+00> : vector<8x32xf32>
    %9 = tpu.matmul %7, %8, %cst_8 {dimension_numbers = #tpu.dot_dimension_numbers<[1], [0], [0], [1], [0, 0, 1, 1], [], []>} : vector<8x32xf32>, vector<32x32xf32>, vector<8x32xf32> -> vector<8x32xf32>
    %c0_9 = arith.constant 0 : index
    %c0_10 = arith.constant 0 : index
    %10 = vector.load %arg5[%c0_9, %c0_10] : memref<1x32xf32, #tpu.memory_space<vmem>>, vector<1x32xf32>
    %11 = vector.broadcast %10 : vector<1x32xf32> to vector<8x32xf32>
    %12 = arith.addf %9, %11 : vector<8x32xf32>
    %cst_11 = arith.constant 0.000000e+00 : f32
    %13 = vector.broadcast %cst_11 : f32 to vector<8x32xf32>
    %14 = arith.maximumf %12, %13 : vector<8x32xf32>
    %c0_12 = arith.constant 0 : index
    %c0_13 = arith.constant 0 : index
    %15 = vector.load %arg6[%c0_12, %c0_13] : memref<32x32xf32, #tpu.memory_space<vmem>>, vector<32x32xf32>
    %cst_14 = arith.constant dense<0.000000e+00> : vector<8x32xf32>
    %16 = tpu.matmul %14, %15, %cst_14 {dimension_numbers = #tpu.dot_dimension_numbers<[1], [0], [0], [1], [0, 0, 1, 1], [], []>} : vector<8x32xf32>, vector<32x32xf32>, vector<8x32xf32> -> vector<8x32xf32>
    %c0_15 = arith.constant 0 : index
    %c0_16 = arith.constant 0 : index
    %17 = vector.load %arg7[%c0_15, %c0_16] : memref<1x32xf32, #tpu.memory_space<vmem>>, vector<1x32xf32>
    %18 = vector.broadcast %17 : vector<1x32xf32> to vector<8x32xf32>
    %19 = arith.addf %16, %18 : vector<8x32xf32>
    %cst_17 = arith.constant 0.000000e+00 : f32
    %20 = vector.broadcast %cst_17 : f32 to vector<8x32xf32>
    %21 = arith.maximumf %19, %20 : vector<8x32xf32>
    %c0_18 = arith.constant 0 : index
    %c0_19 = arith.constant 0 : index
    %22 = vector.load %arg8[%c0_18, %c0_19] : memref<32x8xf32, #tpu.memory_space<vmem>>, vector<32x8xf32>
    %cst_20 = arith.constant dense<0.000000e+00> : vector<8x8xf32>
    %23 = tpu.matmul %21, %22, %cst_20 {dimension_numbers = #tpu.dot_dimension_numbers<[1], [0], [0], [1], [0, 0, 1, 1], [], []>} : vector<8x32xf32>, vector<32x8xf32>, vector<8x8xf32> -> vector<8x8xf32>
    %c0_21 = arith.constant 0 : index
    %c0_22 = arith.constant 0 : index
    %24 = vector.load %arg9[%c0_21, %c0_22] : memref<1x8xf32, #tpu.memory_space<vmem>>, vector<1x8xf32>
    %25 = vector.broadcast %24 : vector<1x8xf32> to vector<8x8xf32>
    %26 = arith.addf %23, %25 : vector<8x8xf32>
    %cst_23 = arith.constant dense<0xFF800000> : vector<8xf32>
    %27 = vector.multi_reduction <maximumf>, %26, %cst_23 [1] : vector<8x8xf32> to vector<8xf32>
    %28 = vector.shape_cast %27 : vector<8xf32> to vector<8x1xf32>
    %29 = vector.broadcast %28 : vector<8x1xf32> to vector<8x8xf32>
    %30 = arith.subf %26, %29 : vector<8x8xf32>
    %31 = math.exp %30 : vector<8x8xf32>
    %cst_24 = arith.constant dense<0.000000e+00> : vector<8xf32>
    %32 = vector.multi_reduction <add>, %31, %cst_24 [1] : vector<8x8xf32> to vector<8xf32>
    %33 = vector.shape_cast %32 : vector<8xf32> to vector<8x1xf32>
    %34 = tpu.reciprocal %33 {approx = true} : vector<8x1xf32> -> vector<8x1xf32>
    %35 = vector.broadcast %34 : vector<8x1xf32> to vector<8x8xf32>
    %36 = arith.mulf %31, %35 : vector<8x8xf32>
    %c0_25 = arith.constant 0 : index
    %c0_26 = arith.constant 0 : index
    %37 = vector.load %arg10[%c0_25, %c0_26] : memref<8x8xf32, #tpu.memory_space<vmem>>, vector<8x8xf32>
    tpu.vector_store %arg10[%c0_25, %c0_26], %36 {strides = array<i32>} : memref<8x8xf32, #tpu.memory_space<vmem>>, vector<8x8xf32>,
    return
  }
  func.func @transform_0(%arg0: i32) -> (i32, i32) {
    %c0_i32 = arith.constant 0 : i32
    %c0_i32_0 = arith.constant 0 : i32
    return %arg0, %c0_i32 : i32, i32
  }
  func.func @transform_1(%arg0: i32) -> (i32, i32) {
    %c0_i32 = arith.constant 0 : i32
    %c0_i32_0 = arith.constant 0 : i32
    %c0_i32_1 = arith.constant 0 : i32
    return %c0_i32, %c0_i32_0 : i32, i32
  }
  func.func @transform_2(%arg0: i32) -> (i32, i32) {
    %c0_i32 = arith.constant 0 : i32
    %c0_i32_0 = arith.constant 0 : i32
    %c0_i32_1 = arith.constant 0 : i32
    return %c0_i32, %c0_i32_0 : i32, i32
  }
  func.func @transform_3(%arg0: i32) -> (i32, i32) {
    %c0_i32 = arith.constant 0 : i32
    %c0_i32_0 = arith.constant 0 : i32
    %c0_i32_1 = arith.constant 0 : i32
    return %c0_i32, %c0_i32_0 : i32, i32
  }
  func.func @transform_4(%arg0: i32) -> (i32, i32) {
    %c0_i32 = arith.constant 0 : i32
    %c0_i32_0 = arith.constant 0 : i32
    %c0_i32_1 = arith.constant 0 : i32
    return %c0_i32, %c0_i32_0 : i32, i32
  }
  func.func @transform_5(%arg0: i32) -> (i32, i32) {
    %c0_i32 = arith.constant 0 : i32
    %c0_i32_0 = arith.constant 0 : i32
    %c0_i32_1 = arith.constant 0 : i32
    return %c0_i32, %c0_i32_0 : i32, i32
  }
  func.func @transform_6(%arg0: i32) -> (i32, i32) {
    %c0_i32 = arith.constant 0 : i32
    %c0_i32_0 = arith.constant 0 : i32
    %c0_i32_1 = arith.constant 0 : i32
    return %c0_i32, %c0_i32_0 : i32, i32
  }
  func.func @transform_7(%arg0: i32) -> (i32, i32) {
    %c0_i32 = arith.constant 0 : i32
    %c0_i32_0 = arith.constant 0 : i32
    %c0_i32_1 = arith.constant 0 : i32
    return %c0_i32, %c0_i32_0 : i32, i32
  }
  func.func @transform_8(%arg0: i32) -> (i32, i32) {
    %c0_i32 = arith.constant 0 : i32
    %c0_i32_0 = arith.constant 0 : i32
    %c0_i32_1 = arith.constant 0 : i32
    return %c0_i32, %c0_i32_0 : i32, i32
  }
  func.func @transform_9(%arg0: i32) -> (i32, i32) {
    %c0_i32 = arith.constant 0 : i32
    %c0_i32_0 = arith.constant 0 : i32
    return %arg0, %c0_i32 : i32, i32
  }
}

</mosaic_0001>

<bundles_post_ra>
// kernel: tpu_custom_call.1
= control target key start
LH: loop header
LB: loop body
LE: loop exit
PB: predicated region body
PF: predicated region fallthrough
CT: control target
= control target key end

     0   :  { %14 = vsyncpa [#allocation3], 0  ;;  %s688_s0 = inlined_call_operand.vmem [shape: f32[8,16], index: 0, kind: input, shape index: {}]   ;;  %s689_s1 = inlined_call_operand.hbm [shape: f32[16,32], index: 1, kind: input, shape index: {}]   ;;  %s690_s2 = inlined_call_operand.vmem [shape: f32[1,32], index: 2, kind: input, shape index: {}]   ;;  %s691_s3 = inlined_call_operand.vmem [shape: f32[32,32], index: 3, kind: input, shape index: {}]   ;;  %s692_s4 = inlined_call_operand.vmem [shape: f32[1,32], index: 4, kind: input, shape index: {}]   ;;  %s693_s5 = inlined_call_operand.hbm [shape: f32[32,32], index: 5, kind: input, shape index: {}]   ;;  %s694_s6 = inlined_call_operand.vmem [shape: f32[1,32], index: 6, kind: input, shape index: {}]   ;;  %s695_s7 = inlined_call_operand.vmem [shape: f32[32,8], index: 7, kind: input, shape index: {}]   ;;  %s696_s8 = inlined_call_operand.vmem [shape: f32[1,8], index: 8, kind: input, shape index: {}]   ;;  %s697_s9 = inlined_call_operand.hbm [shape: f32[8,8], index: 9, kind: output, shape index: {}]  }
   0x1   :  { %15 = vsyncpa [#allocation6], 0 }
   0x2   :  { %16 = vsyncpa [#allocation4], 0  ;;  %s573_s30 = smov [#allocation2]  }
   0x3   :  { %s24_s10 = sshll.u32 %s573_s30, 4  ;;  %s25_s10 = int_to_ptr.vmem [resolvable:$true] %s24_s10 }
   0x4   :  { %s515_s11 = scalar_lea.vmem %s25_s10, 256  ;;  %p520_p1 = scmp.lt.s32.totalorder %s25_s10, %s25_s10 }
   0x5   :  { %p516_p0 = scmp.ne.s32.totalorder %s25_s10, %s515_s11  ;;  %p521_p2 = scmp.lt.s32.totalorder %s515_s11, %s515_s11 }
   0x7   :  { %p522_p3 = por %p521_p2, %p520_p1 }
   0x9   :  { %p523_p4 = pnand %p522_p3, %p516_p0 }
   0xb   :  { %526 = shalt.err (!%p523_p4)
}
   0xc   :  { %s574_s12 = smov 128   ;;  %s575_s13 = smov 8  }
   0xd   :  { %30 = dma.hbm_to_vmem [thread:$0]  %s689_s1, 256, %s25_s10, [#allocation3], %s574_s12, %s574_s12, %s575_s13  }
   0xe   :  { %s576_s16 = smov [#allocation5]  }
   0xf   :  { %s42_s17 = sshll.u32 %s576_s16, 4  ;;  %s43_s17 = int_to_ptr.vmem [resolvable:$true] %s42_s17 }
  0x10   :  { %s535_s18 = scalar_lea.vmem %s43_s17, 512  ;;  %p540_p6 = scmp.lt.s32.totalorder %s43_s17, %s43_s17 }
  0x11   :  { %p536_p5 = scmp.ne.s32.totalorder %s43_s17, %s535_s18  ;;  %p541_p7 = scmp.lt.s32.totalorder %s535_s18, %s535_s18 }
  0x13   :  { %p542_p8 = por %p541_p7, %p540_p6 }
  0x15   :  { %p543_p9 = pnand %p542_p8, %p536_p5 }
  0x17   :  { %546 = shalt.err (!%p543_p9)
}
  0x18   :  { %48 = dma.hbm_to_vmem [thread:$0]  %s693_s5, 512, %s43_s17, [#allocation6], %s574_s12, %s574_s12, %s575_s13  }
  0x19   :  { %567 = dma.done.wait [#allocation3], 256  }
  0x1a   :  { %568 = vsyncadd [#allocation3], 4294967040 }
  0x1b   :  { %569 = dma.done.wait [#allocation6], 512  }
  0x1c   :  { %570 = vsyncadd [#allocation6], 4294966784  ;;  %v577_v0 = vmov 0.0   ;;  %vm578_vm0 = vmmov 0   ;;  %v63_v1 = vld [vmem:[#allocation2 + $0x8] sm:$0xff]  ;;  %v62_v2 = vld [vmem:[#allocation2] sm:$0xff] }
  0x1d   :  { %456 = vmatprep.subr.mxu0 %v577_v0  ;;  %460 = vmatprep.mubr.msk.f32.mxu0 %vm578_vm0, %v577_v0  ;;  %v61_v3 = vld [vmem:[%s688_s0] sm:$0xff]  ;;  %vm71_vm1 = vcmask 130048   ;;  %v149_v4 = vld [vmem:[%s691_s3 + $0x18] sm:$0xff]  ;;  %v148_v5 = vld [vmem:[%s691_s3 + $0x10] sm:$0xff]  ;;  %vm157_vm2 = vcmask 261120   ;;  %vm401_vm3 = vcmask 64512  }
  0x1e   :  { %463 = vmatprep.subr.mxu1 %v577_v0  ;;  %471 = vmatprep.mubr.msk.f32.mxu1 %vm578_vm0, %v577_v0  ;;  %v147_v6 = vld [vmem:[%s691_s3 + $0x8] sm:$0xff]  ;;  %v146_v7 = vld [vmem:[%s691_s3] sm:$0xff]  ;;  %v233_v15 = vld [vmem:[#allocation5 + $0x8] sm:$0xff] }
  0x1f   :  { %457 = vmatpush3.msra.mxu0 %v63_v1  ;;  %464 = vmatpush3.msra.mxu1 %v149_v4  ;;  %v235_v8 = vld [vmem:[#allocation5 + $0x18] sm:$0xff]  ;;  %v430_v9 = vld [vmem:[%s690_s2] ss:$0 sm:$0xff]  ;;  %v232_v16 = vld [vmem:[#allocation5] sm:$0xff] }
  0x20   :  { %458 = vmatprep.subr.mxu0 %v577_v0  ;;  %465 = vmatprep.subr.mxu1 %v577_v0  ;;  %v234_v14 = vld [vmem:[#allocation5 + $0x10] sm:$0xff]  ;;  %v320_v17 = vld [vmem:[%s695_s7 + $0x18] sm:$0xff]  ;;  %v319_v23 = vld [vmem:[%s695_s7 + $0x10] sm:$0xff] }
  0x21   :  { %459 = vmatpush3.msra.mxu0 %v62_v2  ;;  %466 = vmatpush3.msra.mxu1 %v148_v5  ;;  %v432_v18 = vld [vmem:[%s692_s4] ss:$0 sm:$0xff]  ;;  %v318_v24 = vld [vmem:[%s695_s7 + $0x8] sm:$0xff] }
  0x22   :  { %461 = vmatmul.mubr.msk.f32.vlgmr.msra.gmra.mxu0 %vm71_vm1, %v61_v3  ;;  %474 = vmatprep.subr.mxu0 %v577_v0  ;;  %v317_v25 = vld [vmem:[%s695_s7] sm:$0xff] }
  0x23   :  { %482 = vmatprep.mubr.msk.f32.mxu0 %vm578_vm0, %v577_v0  ;;  %467 = vmatprep.subr.mxu1 %v577_v0  ;;  %v434_v26 = vld [vmem:[%s694_s6] ss:$0 sm:$0xff]  ;;  %s579_s6 = smov [#allocation7]  }
  0x24   :  { %468 = vmatpush3.msra.mxu1 %v147_v6  ;;  %475 = vmatpush3.msra.mxu0 %v235_v8  ;;  %v436_v31 = vld [vmem:[%s696_s8] ss:$0 sm:$0xff]  ;;  %s420_s7 = sshll.u32 %s579_s6, 4  ;;  %s421_s7 = int_to_ptr.vmem [resolvable:$true] %s420_s7 }
  0x25   :  { %469 = vmatprep.subr.mxu1 %v577_v0  ;;  %476 = vmatprep.subr.mxu0 %v577_v0  ;;  %s547_s8 = scalar_lea.vmem %s421_s7, 128  ;;  %p552_p11 = scmp.lt.s32.totalorder %s421_s7, %s421_s7 }
  0x26   :  { %470 = vmatpush3.msra.mxu1 %v146_v7  ;;  %477 = vmatpush3.msra.mxu0 %v234_v14  ;;  %p548_p10 = scmp.ne.s32.totalorder %s421_s7, %s547_s8  ;;  %p553_p12 = scmp.lt.s32.totalorder %s547_s8, %s547_s8 }
  0x27   :  { %485 = vmatprep.subr.mxu1 %v577_v0  ;;  %478 = vmatprep.subr.mxu0 %v577_v0 }
  0x28   :  { %479 = vmatpush3.msra.mxu0 %v233_v15  ;;  %p554_p13 = por %p553_p12, %p552_p11 }
  0x29   :  { %480 = vmatprep.subr.mxu0 %v577_v0 }
  0x2a   :  { %481 = vmatpush3.msra.mxu0 %v232_v16  ;;  %p555_p0 = pnand %p554_p13, %p548_p10 }
  0xe2   :  { %v141_v10 = vpop.f32.mrf.mxu0 }
  0xe3   :  { %v142_v11 = vadd.f32 %v430_v9, %v141_v10 }
  0xe4   :  { %v462_v12 = vpop.f32.mrf.mxu0 }
  0xe5   :  { %v145_v13 = vmax.f32 %v142_v11, 0.0 }
  0xe7   :  { %472 = vmatmul.mubr.msk.f32.vlgmr.msra.gmra.mxu1 %vm157_vm2, %v145_v13 }
  0xe8   :  { %493 = vmatprep.mubr.msk.f32.mxu1 %vm578_vm0, %v577_v0  ;;  %486 = vmatpush3.msra.mxu1 %v320_v17 }
  0xe9   :  { %487 = vmatprep.subr.mxu1 %v577_v0 }
  0xea   :  { %488 = vmatpush3.msra.mxu1 %v319_v23 }
  0xeb   :  { %489 = vmatprep.subr.mxu1 %v577_v0 }
  0xec   :  { %490 = vmatpush3.msra.mxu1 %v318_v24 }
  0xed   :  { %491 = vmatprep.subr.mxu1 %v577_v0 }
  0xee   :  { %492 = vmatpush3.msra.mxu1 %v317_v25 }
 0x1a7   :  { %v227_v19 = vpop.f32.mrf.mxu1 }
 0x1a8   :  { %v228_v20 = vadd.f32 %v432_v18, %v227_v19 }
 0x1a9   :  { %v473_v21 = vpop.f32.mrf.mxu1 }
 0x1aa   :  { %v231_v22 = vmax.f32 %v228_v20, 0.0 }
 0x1ac   :  { %483 = vmatmul.mubr.msk.f32.vlgmr.msra.gmra.mxu0 %vm157_vm2, %v231_v22 }
 0x26c   :  { %v312_v27 = vpop.f32.mrf.mxu0 }
 0x26d   :  { %v313_v28 = vadd.f32 %v434_v26, %v312_v27 }
 0x26e   :  { %v484_v29 = vpop.f32.mrf.mxu0 }
 0x26f   :  { %v316_v30 = vmax.f32 %v313_v28, 0.0 }
 0x271   :  { %494 = vmatmul.mubr.msk.f32.vlgmr.msra.gmra.mxu1 %vm157_vm2, %v316_v30 }
 0x331   :  { %v397_v32 = vpop.f32.mrf.mxu1 }
 0x332   :  { %v398_v33 = vadd.f32 %v436_v31, %v397_v32 }
 0x333   :  { %v495_v34 = vpop.f32.mrf.mxu1 }
 0x334   :  { %v402_v35 = vsel %vm401_vm3, %v398_v33, -inf }
 0x335   :  { %403 = vmax.xlane.f32.xlu0 %v402_v35 }
 0x3be   :  { %v404_v36 = vpop.xlane.xlu0 %403 }
 0x3bf   :  { %v405_v37 = vsub.f32 %v398_v33, %v404_v36 }
 0x3c1   :  { %v406_v38 = vmul.f32 1.442695, %v405_v37 }
 0x3c3   :  { %503 = vpow2.f32 %v406_v38 }
 0x3d0   :  { %v504_v39 = vpop.eup %503 }
 0x3d1   :  { %v408_v40 = vsel %vm401_vm3, %v504_v39, 0.0 }
 0x3d2   :  { %409 = vadd.xlane.f32.xlu0 %v408_v40 }
 0x45b   :  { %v410_v41 = vpop.xlane.xlu0 %409 }
 0x45c   :  { %505 = vrcp.f32 %v410_v41 }
 0x469   :  { %v506_v42 = vpop.eup %505 }
 0x46a   :  { %v412_v43 = vmul.f32 %v506_v42, %v504_v39 }
 0x46c   :  { %413 = vst.msk [vmem:[#allocation7] sm:$0xff] %vm401_vm3, %v412_v43 }
 0x46d   :  { %558 = shalt.err (!%p555_p0)
}
 0x46e   :  { %423 = dma.vmem_to_hbm [thread:$0]  %s421_s7, 128, %s697_s9, [#allocation4]  }
 0x46f   :  { %571 = dma.done.wait [#allocation4], 128  }
 0x470   :  { %572 = vsyncadd [#allocation4], 4294967168 }
 0x471   :  { %427 = vsyncpa [#allocation3], 1 }
 0x472   :  { %428 = vsyncpa [#allocation6], 1 }
 0x473   :  { %429 = vsyncpa [#allocation4], 1 }

</bundles_post_ra>
